<compile_context>
chip_gen: v7x
topology: tpu7x:2x2x1
jax: 0.10.0
libtpu: 0.0.40
codegen_flags: <defaults>
</compile_context>

<pallas_src>
import jax
import jax.numpy as jnp
from jax import lax
from jax.experimental import pallas as pl
from jax.experimental.pallas import tpu as pltpu


def _round_up(a, b):
    return ((a + b - 1) // b) * b


def _cosine_kernel(x_ref, wn_ref, o_ref):
    # Row-wise L2 normalization of the x tile in f32 (VALU/XLU/EUP work hidden
    # under the MXU), then a bf16 x bf16 -> f32-accumulated contraction on D.
    # No explicit transpose: the RHS contracts on its last dim directly.
    x = x_ref[...]                                                    # (tm, Dp) f32
    inv = pl.reciprocal(
        jnp.sqrt(jnp.sum(x * x, axis=-1, keepdims=True)) + 1e-4)     # (tm, 1)
    xn = (x * inv).astype(wn_ref.dtype)                               # bf16 for MXU
    o_ref[...] = lax.dot_general(
        xn, wn_ref[...],
        dimension_numbers=(((1,), (1,)), ((), ())),                   # (tm, tn)
        preferred_element_type=jnp.float32,
    ).astype(o_ref.dtype)


def cosine_deconf(x, weight, *, tm_max=512, tn_max=512, mxu_dtype=jnp.bfloat16):
    """x: (N, D), weight: (C, D) -> (N, C) cosine-similarity logits."""
    N, D = x.shape
    C, D2 = weight.shape
    assert D == D2

    # --- layout plumbing: lane-dense padding for D and C only (zeros are
    #     exact no-ops for the norms and the logits); N is NOT padded. -------
    Dp = _round_up(max(D, 128), 128)
    Cp = _round_up(max(C, 128), 128)

    x_p = x.astype(jnp.float32)
    if Dp != D:
        x_p = jnp.pad(x_p, ((0, 0), (0, Dp - D)))

    w_p = weight.astype(jnp.float32)
    if (Cp, Dp) != (C, D):
        w_p = jnp.pad(w_p, ((0, Cp - C), (0, Dp - D)))

    # Weight normalized ONCE in the wrapper; XLA fuses pad + normalize + cast
    # and emits the bf16 operand the MXU wants. Padded rows are all-zero and
    # stay zero (0 / 1e-4).
    wn = (w_p / (jnp.linalg.norm(w_p, axis=1, keepdims=True) + 1e-4)
          ).astype(mxu_dtype)                                         # (Cp, Dp)

    # --- tile selection -----------------------------------------------------
    tn = min(_round_up(tn_max, 128), Cp)          # class tile (lane-dense)
    n_tiles_n = pl.cdiv(Cp, tn)

    tm = min(tm_max, _round_up(N, 8))             # row tile (sublane-aligned)
    # Keep both v7x TensorCores busy: guarantee >=2 total grid steps when the
    # batch allows it.
    if pl.cdiv(N, tm) * n_tiles_n < 2 and N >= 16:
        tm = _round_up(pl.cdiv(N, 2), 8)
    n_tiles_m = pl.cdiv(N, tm)

    # Constant weight block index across the grid -> single-buffer it.
    w_bufs = 1 if n_tiles_n == 1 else 2
    w_spec = pl.BlockSpec((tn, Dp), lambda i, j: (j, 0),
                          pipeline_mode=pl.Buffered(w_bufs))

    # VMEM budget: x double-buffer (f32) + weight buffers (bf16) + out
    # double-buffer (f32); leave ~2x headroom, capped v7x-safe.
    itemsize_w = jnp.dtype(mxu_dtype).itemsize
    budget = (2 * tm * Dp * 4
              + w_bufs * tn * Dp * itemsize_w
              + 2 * tm * tn * 4)
    vmem_limit = int(min(56 << 20, max(2 * budget, 32 << 20)))

    out_p = pl.pallas_call(
        _cosine_kernel,
        out_shape=jax.ShapeDtypeStruct((N, Cp), jnp.float32),
        grid_spec=pltpu.PrefetchScalarGridSpec(
            num_scalar_prefetch=0,
            grid=(n_tiles_m, n_tiles_n),
            in_specs=[
                pl.BlockSpec((tm, Dp), lambda i, j: (i, 0)),   # x tile
                w_spec,                                        # normalized w tile
            ],
            out_specs=pl.BlockSpec((tm, tn), lambda i, j: (i, j)),
        ),
        compiler_params=pltpu.CompilerParams(
            dimension_semantics=("parallel", "parallel"),
            vmem_limit_bytes=vmem_limit),
    )(x_p, wn)

    out = out_p if Cp == C else out_p[:, :C]
    return out.astype(x.dtype)


def reference(x, weight):
    xn = x / (jnp.linalg.norm(x, axis=1, keepdims=True) + 1e-4)
    wn = weight / (jnp.linalg.norm(weight, axis=1, keepdims=True) + 1e-4)
    return xn @ wn.T


if __name__ == "__main__":
    key = jax.random.PRNGKey(0)
    k_x, k_w = jax.random.split(key)

    batch = 8
    in_features = 32
    num_classes = 16

    # Deterministic input.
    x = jax.random.normal(k_x, (batch, in_features), dtype=jnp.float32)

    # Kaiming-normal init for nn.Linear weight (out, in), nonlinearity='relu':
    # std = gain / sqrt(fan_in) = sqrt(2 / in_features).
    std = jnp.sqrt(2.0 / in_features)
    weight = std * jax.random.normal(
        k_w, (num_classes, in_features), dtype=jnp.float32)

    out = cosine_deconf(x, weight)
    out = jax.block_until_ready(out)

    ref = reference(x, weight)
    assert out.shape == (batch, num_classes)
    # bf16 MXU operands (f32 accumulation) -> relaxed tolerance vs f32 reference.
    assert jnp.allclose(out, ref, atol=2e-2, rtol=2e-2), "mismatch vs reference"

    print("KERNEL_OK")
</pallas_src>

<mosaic_0001>
module attributes {stable_mosaic.version = 11 : i64} {
  func.func @_cosine_kernel(%arg0: i32, %arg1: i32, %arg2: memref<8x128xf32, #tpu.memory_space<vmem>>, %arg3: memref<128x128xbf16, #tpu.memory_space<vmem>>, %arg4: memref<8x128xf32, #tpu.memory_space<vmem>>) attributes {dimension_semantics = [#tpu.dimension_semantics<parallel>, #tpu.dimension_semantics<parallel>], iteration_bounds = array<i64: 1, 1>, scalar_prefetch = 0 : i64, scratch_operands = 0 : i64, tpu.core_type = #tpu.core_type<tc>, window_params = [{transform_indices = @transform_0, window_bounds = array<i64: 8, 128>}, {pipeline_mode = #tpu.pipeline_mode<synchronous>, transform_indices = @transform_1, window_bounds = array<i64: 128, 128>}, {transform_indices = @transform_2, window_bounds = array<i64: 8, 128>}]} {
    %c0 = arith.constant 0 : index
    %c0_0 = arith.constant 0 : index
    %0 = vector.load %arg2[%c0, %c0_0] : memref<8x128xf32, #tpu.memory_space<vmem>>, vector<8x128xf32>
    %1 = arith.mulf %0, %0 : vector<8x128xf32>
    %cst = arith.constant dense<0.000000e+00> : vector<8xf32>
    %2 = vector.multi_reduction <add>, %1, %cst [1] : vector<8x128xf32> to vector<8xf32>
    %3 = vector.shape_cast %2 : vector<8xf32> to vector<8x1xf32>
    %4 = math.sqrt %3 : vector<8x1xf32>
    %cst_1 = arith.constant 9.99999974E-5 : f32
    %5 = vector.broadcast %cst_1 : f32 to vector<8x1xf32>
    %6 = arith.addf %4, %5 : vector<8x1xf32>
    %7 = tpu.reciprocal %6 : vector<8x1xf32> -> vector<8x1xf32>
    %8 = vector.broadcast %7 : vector<8x1xf32> to vector<8x128xf32>
    %9 = arith.mulf %0, %8 : vector<8x128xf32>
    %10 = arith.truncf %9 : vector<8x128xf32> to vector<8x128xbf16>
    %c0_2 = arith.constant 0 : index
    %c0_3 = arith.constant 0 : index
    %11 = vector.load %arg3[%c0_2, %c0_3] : memref<128x128xbf16, #tpu.memory_space<vmem>>, vector<128x128xbf16>
    %cst_4 = arith.constant dense<0.000000e+00> : vector<8x128xf32>
    %12 = tpu.matmul %10, %11, %cst_4 {dimension_numbers = #tpu.dot_dimension_numbers<[1], [1], [0], [0], [0, 0, 1, 0], [], []>} : vector<8x128xbf16>, vector<128x128xbf16>, vector<8x128xf32> -> vector<8x128xf32>
    %c0_5 = arith.constant 0 : index
    %c0_6 = arith.constant 0 : index
    %13 = vector.load %arg4[%c0_5, %c0_6] : memref<8x128xf32, #tpu.memory_space<vmem>>, vector<8x128xf32>
    tpu.vector_store %arg4[%c0_5, %c0_6], %12 {strides = array<i32>} : memref<8x128xf32, #tpu.memory_space<vmem>>, vector<8x128xf32>,
    return
  }
  func.func @transform_0(%arg0: i32, %arg1: i32) -> (i32, i32) {
    %c0_i32 = arith.constant 0 : i32
    %c0_i32_0 = arith.constant 0 : i32
    return %arg0, %c0_i32 : i32, i32
  }
  func.func @transform_1(%arg0: i32, %arg1: i32) -> (i32, i32) {
    %c0_i32 = arith.constant 0 : i32
    %c0_i32_0 = arith.constant 0 : i32
    return %arg1, %c0_i32 : i32, i32
  }
  func.func @transform_2(%arg0: i32, %arg1: i32) -> (i32, i32) {
    %c0_i32 = arith.constant 0 : i32
    return %arg0, %arg1 : i32, i32
  }
}

</mosaic_0001>

<bundles_post_ra>
// kernel: tpu_custom_call.1
= control target key start
LH: loop header
LB: loop body
LE: loop exit
PB: predicated region body
PF: predicated region fallthrough
CT: control target
= control target key end

     0   :  { %7 = vsyncpa [#allocation3], 0  ;;  %s368_s0 = inlined_call_operand.hbm [shape: f32[8,128], index: 0, kind: input, shape index: {}]   ;;  %s369_s1 = inlined_call_operand.hbm [shape: bf16[128,128], index: 1, kind: input, shape index: {}]   ;;  %s370_s2 = inlined_call_operand.hbm [shape: f32[8,128], index: 2, kind: output, shape index: {}]  }
   0x1   :  { %8 = vsyncpa [#allocation6], 0 }
   0x2   :  { %9 = vsyncpa [#allocation4], 0  ;;  %s303_s9 = smov [#allocation2]   ;;  %s304_s11 = smov [#allocation5]  }
   0x3   :  { %s16_s10 = sshll.u32 %s303_s9, 4  ;;  %s25_s12 = sshll.u32 %s304_s11, 4  ;;  %s17_s10 = int_to_ptr.vmem [resolvable:$true] %s16_s10  ;;  %s325_s12 = int_to_ptr.vmem [resolvable:$true] %s25_s12 }
   0x4   :  { %s231_s15 = scalar_lea.hbm %s368_s0, 128 }
   0x5   :  { %p232_p0 = scmp.ne.s32.totalorder %s368_s0, %s231_s15  ;;  %p235_p1 = scmp.lt.u32.totalorder %s231_s15, %s368_s0 }
   0x7   :  { %p237_p2 = pnand %p235_p1, %p232_p0 }
   0x9   :  { %240 = shalt.err (!%p237_p2)
}
   0xa   :  { %s241_s20 = scalar_lea.vmem %s17_s10, 128  ;;  %p246_p4 = scmp.lt.s32.totalorder %s17_s10, %s17_s10 }
   0xb   :  { %p242_p3 = scmp.ne.s32.totalorder %s17_s10, %s241_s20  ;;  %p247_p5 = scmp.lt.s32.totalorder %s241_s20, %s241_s20 }
   0xd   :  { %p248_p6 = por %p247_p5, %p246_p4 }
   0xf   :  { %p249_p7 = pnand %p248_p6, %p242_p3 }
  0x11   :  { %252 = shalt.err (!%p249_p7)
}
  0x12   :  { %19 = dma.hbm_to_vmem [thread:$0]  %s368_s0, 128, %s17_s10, [#allocation3]  }
  0x13   :  { %s253_s25 = scalar_lea.hbm %s369_s1, 1024 }
  0x14   :  { %p254_p8 = scmp.ne.s32.totalorder %s369_s1, %s253_s25  ;;  %p257_p9 = scmp.lt.u32.totalorder %s253_s25, %s369_s1 }
  0x16   :  { %p259_p10 = pnand %p257_p9, %p254_p8 }
  0x18   :  { %262 = shalt.err (!%p259_p10)
}
  0x19   :  { %s263_s30 = scalar_lea.vmem %s325_s12, 1024  ;;  %p268_p12 = scmp.lt.s32.totalorder %s325_s12, %s325_s12 }
  0x1a   :  { %p264_p11 = scmp.ne.s32.totalorder %s325_s12, %s263_s30  ;;  %p269_p13 = scmp.lt.s32.totalorder %s263_s30, %s263_s30 }
  0x1c   :  { %p270_p0 = por %p269_p13, %p268_p12 }
  0x1e   :  { %p271_p1 = pnand %p270_p0, %p264_p11 }
  0x20   :  { %274 = shalt.err (!%p271_p1)
}
  0x21   :  { %s305_s0 = smov 64   ;;  %s306_s3 = smov 4  }
  0x22   :  { %31 = dma.hbm_to_vmem [thread:$0]  %s369_s1, 1024, %s325_s12, [#allocation6], %s305_s0, %s305_s0, %s306_s3  }
  0x23   :  { %297 = dma.done.wait [#allocation3], 128  }
  0x24   :  { %298 = vsyncadd [#allocation3], 4294967168 }
  0x25   :  { %299 = dma.done.wait [#allocation6], 1024  }
  0x26   :  { %300 = vsyncadd [#allocation6], 4294966272  ;;  %v307_v0 = vmov 0.0   ;;  %v39_v1 = vld [vmem:[#allocation2] sm:$0xff]  ;;  %v219_v3 = vld [vmem:[#allocation5] sm:$0xff]   ;;  %vm308_vm0 = vmmov 0  }
  0x27   :  { %192 = vmatprep.subr.bf16.mxu0 %v307_v0  ;;  %v40_v2 = vmul.f32 %v39_v1, %v39_v1  ;;  %v220_v4 = vld [vmem:[#allocation5 + $0x8] sm:$0xff]   ;;  %v221_v5 = vld [vmem:[#allocation5 + $0x10] sm:$0xff]   ;;  %v222_v6 = vld [vmem:[#allocation5 + $0x18] sm:$0xff]   ;;  %208 = vmatprep.mubr.msk.bf16.mxu0 %vm308_vm0, %v307_v0  ;;  %s309_s1 = smov [#allocation7]  }
  0x28   :  { %193 = vmatpush3.bf16.xpose.msra.mxu0 %v219_v3  ;;  %v223_v7 = vld [vmem:[#allocation5 + $0x20] sm:$0xff]   ;;  %v224_v8 = vld [vmem:[#allocation5 + $0x28] sm:$0xff]   ;;  %v225_v9 = vld [vmem:[#allocation5 + $0x30] sm:$0xff]   ;;  %s165_s6 = sshll.u32 %s309_s1, 4  ;;  %s166_s6 = int_to_ptr.vmem [resolvable:$true] %s165_s6 }
  0x29   :  { %41 = vadd.xlane.f32.xlu0 %v40_v2  ;;  %194 = vmatprep.subr.bf16.mxu0 %v307_v0  ;;  %v226_v10 = vld [vmem:[#allocation5 + $0x38] sm:$0xff]   ;;  %s275_s7 = scalar_lea.vmem %s166_s6, 128  ;;  %p280_p3 = scmp.lt.s32.totalorder %s166_s6, %s166_s6 }
  0x2a   :  { %p276_p2 = scmp.ne.s32.totalorder %s166_s6, %s275_s7  ;;  %p281_p4 = scmp.lt.s32.totalorder %s275_s7, %s275_s7 }
  0x2c   :  { %p282_p5 = por %p281_p4, %p280_p3 }
  0x2e   :  { %p283_p6 = pnand %p282_p5, %p276_p2 }
  0x30   :  { %195 = vmatpush3.bf16.xpose.msra.mxu0 %v220_v4 }
  0x31   :  { %196 = vmatprep.subr.bf16.mxu0 %v307_v0 }
  0x38   :  { %197 = vmatpush3.bf16.xpose.msra.mxu0 %v221_v5 }
  0x39   :  { %198 = vmatprep.subr.bf16.mxu0 %v307_v0 }
  0x40   :  { %199 = vmatpush3.bf16.xpose.msra.mxu0 %v222_v6 }
  0x41   :  { %200 = vmatprep.subr.bf16.mxu0 %v307_v0 }
  0x48   :  { %201 = vmatpush3.bf16.xpose.msra.mxu0 %v223_v7 }
  0x49   :  { %202 = vmatprep.subr.bf16.mxu0 %v307_v0 }
  0x50   :  { %203 = vmatpush3.bf16.xpose.msra.mxu0 %v224_v8 }
  0x51   :  { %204 = vmatprep.subr.bf16.mxu0 %v307_v0 }
  0x58   :  { %205 = vmatpush3.bf16.xpose.msra.mxu0 %v225_v9 }
  0x59   :  { %206 = vmatprep.subr.bf16.mxu0 %v307_v0 }
  0x60   :  { %207 = vmatpush3.bf16.xpose.msra.mxu0 %v226_v10 }
  0xb6   :  { %v42_v11 = vpop.xlane.xlu0 %41 }
  0xb7   :  { %227 = vrsqrt.f32 %v42_v11  ;;  %vm45_vm1 = vcmp.eq.f32.partialorder %v42_v11, inf  ;;  %v48_v14 = vand.u32 2147483648, %v42_v11  ;;  %vm47_vm2 = vcmp.eq.f32.partialorder %v42_v11, 0.0 }
  0xc1   :  { %v228_v12 = vpop.eup %227 }
  0xc2   :  { %v44_v13 = vmul.f32 %v228_v12, %v42_v11 }
  0xc4   :  { %v46_v15 = vsel %vm45_vm1, %v42_v11, %v44_v13 }
  0xc5   :  { %v49_v16 = vsel %vm47_vm2, %v48_v14, %v46_v15 }
  0xc6   :  { %v50_v17 = vadd.f32 0.0001, %v49_v16 }
  0xc8   :  { %229 = vrcp.f32 %v50_v17 }
  0xd2   :  { %v230_v18 = vpop.eup %229 }
  0xd3   :  { %v52_v19 = vmul.f32 %v230_v18, %v39_v1 }
  0xd5   :  { %v53_v20 = vpack.c.bf16 %v52_v19, %v52_v19 }
  0xd7   :  { %209 = vmatmul.mubr.bf16.vlgmr.msra.gmra.mrb[0].mxu0 %v53_v20 }
 0x1aa   :  { %v152_v21 = vpop.f32.mrb[0].mxu0 }
 0x1ab   :  { %158 = vst [vmem:[#allocation7] sm:$0xff] %v152_v21  ;;  %v210_v22 = vpop.f32.mrb[1].mxu0 }
 0x1ac   :  { %v155_v23 = vpop.f32.mrb[2].mxu0 }
 0x1ad   :  { %286 = shalt.err (!%p283_p6)
}
 0x1ae   :  { %s287_s10 = scalar_lea.hbm %s370_s2, 128 }
 0x1af   :  { %p288_p7 = scmp.ne.s32.totalorder %s370_s2, %s287_s10  ;;  %p291_p8 = scmp.lt.u32.totalorder %s287_s10, %s370_s2 }
 0x1b1   :  { %p293_p9 = pnand %p291_p8, %p288_p7 }
 0x1b3   :  { %296 = shalt.err (!%p293_p9)
}
 0x1b4   :  { %168 = dma.vmem_to_hbm [thread:$0]  %s166_s6, 128, %s370_s2, [#allocation4]   ;;  %v211_v24 = vpop.f32.mrb[3].mxu0 }
 0x1b5   :  { %301 = dma.done.wait [#allocation4], 128  }
 0x1b6   :  { %302 = vsyncadd [#allocation4], 4294967168 }
 0x1b7   :  { %172 = vsyncpa [#allocation3], 1 }
 0x1b8   :  { %173 = vsyncpa [#allocation6], 1 }
 0x1b9   :  { %174 = vsyncpa [#allocation4], 1 }

</bundles_post_ra>
